<compile_context>
chip_gen: v7x
topology: tpu7x:2x2x1
jax: 0.10.0
libtpu: 0.0.40
codegen_flags: <defaults>
</compile_context>

<pallas_src>
import functools

import jax
import jax.numpy as jnp
from jax import lax
from jax.experimental import pallas as pl
from jax.experimental.pallas import tpu as pltpu

MAX_DEC_LENGTH = 100
MAX_TYPE_NUM = 5


def _layernorm(x, w, b, eps):
    mean = jnp.mean(x, axis=-1, keepdims=True)
    var = jnp.mean((x - mean) ** 2, axis=-1, keepdims=True)
    return (x - mean) * lax.rsqrt(var + eps) * w + b


def _prev_pred_kernel(prev_ref,      # SMEM (B, T) int32            [scalar prefetch]
                      emb_tab_ref,   # VMEM (2, T, H) f32           LN(pos + type_k), k in {0,1}
                      ln_ref,        # VMEM (4, H) f32              [ans_w, ans_b, ocr_w, ocr_b]
                      ans_ref,       # VMEM (A, H)                  resident (constant index_map)
                      ocr_ref,       # VMEM (O, H)                  ocr[b], auto-pipelined
                      out_ref,       # VMEM (T, H)
                      gbuf,          # VMEM (T, H) f32 scratch: gathered raw rows
                      wbuf,          # VMEM (T, H) f32 scratch: per-row LN scale
                      bbuf,          # VMEM (T, H) f32 scratch: per-row LN bias + pos/type emb
                      *, eps, ans_num, ocr_num):
    b = pl.program_id(0)
    T = out_ref.shape[0]

    # Hoist the (1, H) affine rows out of the gather loop (loads are not CSE'd per-iter).
    ans_w = ln_ref[0:1, :]
    ans_b = ln_ref[1:2, :]
    ocr_w = ln_ref[2:3, :]
    ocr_b = ln_ref[3:4, :]

    # ---- gather: T dynamic-slice row reads from VMEM, per-row param select (scalar vsel) ----
    # TODO(synk): at T = MAX_DEC_LENGTH switch this unrolled loop to lax.fori_loop(unroll=4..8);
    #             at the toy T=8 the full unroll is preferred.
    for t in range(T):
        idx = prev_ref[b, t]
        is_ans = idx < ans_num
        a_idx = jnp.clip(idx, 0, ans_num - 1)
        o_idx = jnp.clip(idx - ans_num, 0, ocr_num - 1)

        a_row = ans_ref[pl.ds(a_idx, 1), :].astype(jnp.float32)       # (1, H)
        o_row = ocr_ref[pl.ds(o_idx, 1), :].astype(jnp.float32)       # (1, H)

        gbuf[t:t + 1, :] = jnp.where(is_ans, a_row, o_row)
        wbuf[t:t + 1, :] = jnp.where(is_ans, ans_w, ocr_w)
        bbuf[t:t + 1, :] = (jnp.where(is_ans, ans_b, ocr_b)
                            + jnp.where(is_ans,
                                        emb_tab_ref[0, t:t + 1, :],
                                        emb_tab_ref[1, t:t + 1, :]))

    # ---- vectorized LayerNorm over the T gathered rows + add pos/type embedding ----
    x = gbuf[...]                                                      # (T, H) f32
    mean = jnp.mean(x, axis=-1, keepdims=True)
    var = jnp.mean((x - mean) ** 2, axis=-1, keepdims=True)
    out = (x - mean) * lax.rsqrt(var + eps) * wbuf[...] + bbuf[...]
    # TODO(synk): emb_dropout omitted (eval-mode identity)
    out_ref[...] = out.astype(out_ref.dtype)


def prev_pred_embeddings(ans_emb, ocr_emb, prev_inds, params, eps=1e-12):
    A, H = ans_emb.shape
    B, O, _ = ocr_emb.shape
    T = prev_inds.shape[1]
    assert ans_emb.dtype == ocr_emb.dtype

    # Clamp indices defensively (in-kernel reads are also clamped, so no OOB access possible).
    prev_inds = jnp.clip(prev_inds.astype(jnp.int32), 0, A + O - 1)

    # Batch-invariant precompute, hoisted out of the per-batch grid loop (pure XLA, tiny):
    pos = params["pos_table"][:T].astype(jnp.float32)                    # (T, H)
    tt2 = params["type_table"][:2].astype(jnp.float32)                   # (2, H) only ids {0,1}
    emb_tab = _layernorm(pos[None] + tt2[:, None],
                         params["emb_w"], params["emb_b"], eps)          # (2, T, H)
    ln_params = jnp.stack([params["ans_w"], params["ans_b"],
                           params["ocr_w"], params["ocr_b"]],
                          axis=0).astype(jnp.float32)                    # (4, H)

    kernel = functools.partial(_prev_pred_kernel, eps=eps, ans_num=A, ocr_num=O)
    grid_spec = pltpu.PrefetchScalarGridSpec(
        num_scalar_prefetch=1,                       # prev_inds -> SMEM, drives the row gather
        grid=(B,),
        in_specs=[
            pl.BlockSpec((2, T, H), lambda b, p: (0, 0, 0)),     # LN'd pos+type table (shared)
            pl.BlockSpec((4, H), lambda b, p: (0, 0)),           # ans/ocr LN affine params
            pl.BlockSpec((A, H), lambda b, p: (0, 0)),           # ans table resident in VMEM
            pl.BlockSpec((None, O, H), lambda b, p: (b, 0, 0)),  # ocr[b], auto double-buffered
        ],
        out_specs=pl.BlockSpec((None, T, H), lambda b, p: (b, 0, 0)),
        scratch_shapes=[
            pltpu.VMEM((T, H), jnp.float32),   # gathered raw rows
            pltpu.VMEM((T, H), jnp.float32),   # per-row LN scale
            pltpu.VMEM((T, H), jnp.float32),   # per-row LN bias + pos/type embedding
        ],
    )
    return pl.pallas_call(
        kernel,
        out_shape=jax.ShapeDtypeStruct((B, T, H), ans_emb.dtype),
        grid_spec=grid_spec,
        compiler_params=pltpu.CompilerParams(dimension_semantics=("parallel",)),
    )(prev_inds, emb_tab, ln_params, ans_emb, ocr_emb)


def reference(ans_emb, ocr_emb, prev_inds, params, eps=1e-12):
    A = ans_emb.shape[0]
    B, _, _ = ocr_emb.shape
    T = prev_inds.shape[1]
    ans_ln = _layernorm(ans_emb, params["ans_w"], params["ans_b"], eps)
    ocr_ln = _layernorm(ocr_emb, params["ocr_w"], params["ocr_b"], eps)
    cat = jnp.concatenate(
        [jnp.broadcast_to(ans_ln[None], (B,) + ans_ln.shape), ocr_ln], axis=1)
    raw = jnp.take_along_axis(cat, prev_inds[..., None], axis=1)
    pos = params["pos_table"][:T][None]
    tt = params["type_table"][(prev_inds >= A).astype(jnp.int32)]
    emb = _layernorm(pos + tt, params["emb_w"], params["emb_b"], eps)
    return raw + emb


if __name__ == "__main__":
    B, T, H = 2, 8, 32       # batch, max decode steps, hidden_size
    A, O = 8, 8              # num answer-vocab words, num OCR tokens
    eps = 1e-12

    key = jax.random.PRNGKey(0)
    k = jax.random.split(key, 8)
    params = {
        "pos_table": jax.random.normal(k[0], (MAX_DEC_LENGTH, H), jnp.float32) * 0.02,
        "type_table": jax.random.normal(k[1], (MAX_TYPE_NUM, H), jnp.float32) * 0.02,
        "ans_w": jnp.ones((H,), jnp.float32), "ans_b": jnp.zeros((H,), jnp.float32),
        "ocr_w": jnp.ones((H,), jnp.float32), "ocr_b": jnp.zeros((H,), jnp.float32),
        "emb_w": jnp.ones((H,), jnp.float32), "emb_b": jnp.zeros((H,), jnp.float32),
    }
    ans_emb = jax.random.normal(k[2], (A, H), jnp.float32)
    ocr_emb = jax.random.normal(k[3], (B, O, H), jnp.float32)
    prev_inds = jax.random.randint(k[4], (B, T), 0, A + O, dtype=jnp.int32)

    out = prev_pred_embeddings(ans_emb, ocr_emb, prev_inds, params, eps)
    out = jax.block_until_ready(out)

    ref = reference(ans_emb, ocr_emb, prev_inds, params, eps)
    assert out.shape == (B, T, H)
    assert jnp.allclose(out, ref, atol=1e-5, rtol=1e-5), "mismatch vs JAX reference"
    print("KERNEL_OK")
</pallas_src>

<mosaic_0001>
module attributes {stable_mosaic.version = 11 : i64} {
  func.func @_prev_pred_kernel(%arg0: i32, %arg1: memref<2x8xi32, #tpu.memory_space<smem>>, %arg2: memref<2x8x32xf32, #tpu.memory_space<vmem>>, %arg3: memref<4x32xf32, #tpu.memory_space<vmem>>, %arg4: memref<8x32xf32, #tpu.memory_space<vmem>>, %arg5: memref<1x8x32xf32, #tpu.memory_space<vmem>>, %arg6: memref<1x8x32xf32, #tpu.memory_space<vmem>>, %arg7: memref<8x32xf32, #tpu.memory_space<vmem>>, %arg8: memref<8x32xf32, #tpu.memory_space<vmem>>, %arg9: memref<8x32xf32, #tpu.memory_space<vmem>>) attributes {dimension_semantics = [#tpu.dimension_semantics<parallel>], iteration_bounds = array<i64: 2>, scalar_prefetch = 1 : i64, scratch_operands = 3 : i64, tpu.core_type = #tpu.core_type<tc>, window_params = [{pipeline_mode = #tpu.pipeline_mode<synchronous>, transform_indices = @transform_0, window_bounds = array<i64: 2, 8, 32>}, {pipeline_mode = #tpu.pipeline_mode<synchronous>, transform_indices = @transform_1, window_bounds = array<i64: 4, 32>}, {pipeline_mode = #tpu.pipeline_mode<synchronous>, transform_indices = @transform_2, window_bounds = array<i64: 8, 32>}, {transform_indices = @transform_3, window_bounds = array<i64: 1, 8, 32>}, {transform_indices = @transform_4, window_bounds = array<i64: 1, 8, 32>}]} {
    %c0 = arith.constant 0 : index
    %c0_0 = arith.constant 0 : index
    %0 = vector.load %arg3[%c0, %c0_0] : memref<4x32xf32, #tpu.memory_space<vmem>>, vector<1x32xf32>
    %c1 = arith.constant 1 : index
    %c0_1 = arith.constant 0 : index
    %1 = vector.load %arg3[%c1, %c0_1] : memref<4x32xf32, #tpu.memory_space<vmem>>, vector<1x32xf32>
    %c2 = arith.constant 2 : index
    %c0_2 = arith.constant 0 : index
    %2 = vector.load %arg3[%c2, %c0_2] : memref<4x32xf32, #tpu.memory_space<vmem>>, vector<1x32xf32>
    %c3 = arith.constant 3 : index
    %c0_3 = arith.constant 0 : index
    %3 = vector.load %arg3[%c3, %c0_3] : memref<4x32xf32, #tpu.memory_space<vmem>>, vector<1x32xf32>
    %4 = arith.index_cast %arg0 : i32 to index
    %c0_4 = arith.constant 0 : index
    %5 = memref.load %arg1[%4, %c0_4] : memref<2x8xi32, #tpu.memory_space<smem>>
    %c8_i32 = arith.constant 8 : i32
    %6 = arith.cmpi slt, %5, %c8_i32 : i32
    %c0_i32 = arith.constant 0 : i32
    %c7_i32 = arith.constant 7 : i32
    %7 = arith.maxsi %c0_i32, %5 : i32
    %8 = arith.minsi %c7_i32, %7 : i32
    %c8_i32_5 = arith.constant 8 : i32
    %9 = arith.subi %5, %c8_i32_5 : i32
    %c0_i32_6 = arith.constant 0 : i32
    %c7_i32_7 = arith.constant 7 : i32
    %10 = arith.maxsi %c0_i32_6, %9 : i32
    %11 = arith.minsi %c7_i32_7, %10 : i32
    %12 = arith.index_cast %8 : i32 to index
    %c0_8 = arith.constant 0 : index
    %13 = vector.load %arg4[%12, %c0_8] : memref<8x32xf32, #tpu.memory_space<vmem>>, vector<1x32xf32>
    %c0_9 = arith.constant 0 : index
    %14 = arith.index_cast %11 : i32 to index
    %c0_10 = arith.constant 0 : index
    %15 = vector.load %arg5[%c0_9, %14, %c0_10] : memref<1x8x32xf32, #tpu.memory_space<vmem>>, vector<1x1x32xf32>
    %16 = vector.shape_cast %15 : vector<1x1x32xf32> to vector<1x32xf32>
    %17 = arith.select %6, %13, %16 : vector<1x32xf32>
    %c0_11 = arith.constant 0 : index
    %c0_12 = arith.constant 0 : index
    %18 = vector.load %arg7[%c0_11, %c0_12] : memref<8x32xf32, #tpu.memory_space<vmem>>, vector<1x32xf32>
    tpu.vector_store %arg7[%c0_11, %c0_12], %17 {strides = array<i32>} : memref<8x32xf32, #tpu.memory_space<vmem>>, vector<1x32xf32>,
    %19 = arith.select %6, %0, %2 : vector<1x32xf32>
    %c0_13 = arith.constant 0 : index
    %c0_14 = arith.constant 0 : index
    %20 = vector.load %arg8[%c0_13, %c0_14] : memref<8x32xf32, #tpu.memory_space<vmem>>, vector<1x32xf32>
    tpu.vector_store %arg8[%c0_13, %c0_14], %19 {strides = array<i32>} : memref<8x32xf32, #tpu.memory_space<vmem>>, vector<1x32xf32>,
    %21 = arith.select %6, %1, %3 : vector<1x32xf32>
    %c0_15 = arith.constant 0 : index
    %c0_16 = arith.constant 0 : index
    %c0_17 = arith.constant 0 : index
    %22 = vector.load %arg2[%c0_15, %c0_16, %c0_17] : memref<2x8x32xf32, #tpu.memory_space<vmem>>, vector<1x1x32xf32>
    %23 = vector.shape_cast %22 : vector<1x1x32xf32> to vector<1x32xf32>
    %c1_18 = arith.constant 1 : index
    %c0_19 = arith.constant 0 : index
    %c0_20 = arith.constant 0 : index
    %24 = vector.load %arg2[%c1_18, %c0_19, %c0_20] : memref<2x8x32xf32, #tpu.memory_space<vmem>>, vector<1x1x32xf32>
    %25 = vector.shape_cast %24 : vector<1x1x32xf32> to vector<1x32xf32>
    %26 = arith.select %6, %23, %25 : vector<1x32xf32>
    %27 = arith.addf %21, %26 : vector<1x32xf32>
    %c0_21 = arith.constant 0 : index
    %c0_22 = arith.constant 0 : index
    %28 = vector.load %arg9[%c0_21, %c0_22] : memref<8x32xf32, #tpu.memory_space<vmem>>, vector<1x32xf32>
    tpu.vector_store %arg9[%c0_21, %c0_22], %27 {strides = array<i32>} : memref<8x32xf32, #tpu.memory_space<vmem>>, vector<1x32xf32>,
    %29 = arith.index_cast %arg0 : i32 to index
    %c1_23 = arith.constant 1 : index
    %30 = memref.load %arg1[%29, %c1_23] : memref<2x8xi32, #tpu.memory_space<smem>>
    %c8_i32_24 = arith.constant 8 : i32
    %31 = arith.cmpi slt, %30, %c8_i32_24 : i32
    %c0_i32_25 = arith.constant 0 : i32
    %c7_i32_26 = arith.constant 7 : i32
    %32 = arith.maxsi %c0_i32_25, %30 : i32
    %33 = arith.minsi %c7_i32_26, %32 : i32
    %c8_i32_27 = arith.constant 8 : i32
    %34 = arith.subi %30, %c8_i32_27 : i32
    %c0_i32_28 = arith.constant 0 : i32
    %c7_i32_29 = arith.constant 7 : i32
    %35 = arith.maxsi %c0_i32_28, %34 : i32
    %36 = arith.minsi %c7_i32_29, %35 : i32
    %37 = arith.index_cast %33 : i32 to index
    %c0_30 = arith.constant 0 : index
    %38 = vector.load %arg4[%37, %c0_30] : memref<8x32xf32, #tpu.memory_space<vmem>>, vector<1x32xf32>
    %c0_31 = arith.constant 0 : index
    %39 = arith.index_cast %36 : i32 to index
    %c0_32 = arith.constant 0 : index
    %40 = vector.load %arg5[%c0_31, %39, %c0_32] : memref<1x8x32xf32, #tpu.memory_space<vmem>>, vector<1x1x32xf32>
    %41 = vector.shape_cast %40 : vector<1x1x32xf32> to vector<1x32xf32>
    %42 = arith.select %31, %38, %41 : vector<1x32xf32>
    %c1_33 = arith.constant 1 : index
    %c0_34 = arith.constant 0 : index
    %43 = vector.load %arg7[%c1_33, %c0_34] : memref<8x32xf32, #tpu.memory_space<vmem>>, vector<1x32xf32>
    tpu.vector_store %arg7[%c1_33, %c0_34], %42 {strides = array<i32>} : memref<8x32xf32, #tpu.memory_space<vmem>>, vector<1x32xf32>,
    %44 = arith.select %31, %0, %2 : vector<1x32xf32>
    %c1_35 = arith.constant 1 : index
    %c0_36 = arith.constant 0 : index
    %45 = vector.load %arg8[%c1_35, %c0_36] : memref<8x32xf32, #tpu.memory_space<vmem>>, vector<1x32xf32>
    tpu.vector_store %arg8[%c1_35, %c0_36], %44 {strides = array<i32>} : memref<8x32xf32, #tpu.memory_space<vmem>>, vector<1x32xf32>,
    %46 = arith.select %31, %1, %3 : vector<1x32xf32>
    %c0_37 = arith.constant 0 : index
    %c1_38 = arith.constant 1 : index
    %c0_39 = arith.constant 0 : index
    %47 = vector.load %arg2[%c0_37, %c1_38, %c0_39] : memref<2x8x32xf32, #tpu.memory_space<vmem>>, vector<1x1x32xf32>
    %48 = vector.shape_cast %47 : vector<1x1x32xf32> to vector<1x32xf32>
    %c1_40 = arith.constant 1 : index
    %c1_41 = arith.constant 1 : index
    %c0_42 = arith.constant 0 : index
    %49 = vector.load %arg2[%c1_40, %c1_41, %c0_42] : memref<2x8x32xf32, #tpu.memory_space<vmem>>, vector<1x1x32xf32>
    %50 = vector.shape_cast %49 : vector<1x1x32xf32> to vector<1x32xf32>
    %51 = arith.select %31, %48, %50 : vector<1x32xf32>
    %52 = arith.addf %46, %51 : vector<1x32xf32>
    %c1_43 = arith.constant 1 : index
    %c0_44 = arith.constant 0 : index
    %53 = vector.load %arg9[%c1_43, %c0_44] : memref<8x32xf32, #tpu.memory_space<vmem>>, vector<1x32xf32>
    tpu.vector_store %arg9[%c1_43, %c0_44], %52 {strides = array<i32>} : memref<8x32xf32, #tpu.memory_space<vmem>>, vector<1x32xf32>,
    %54 = arith.index_cast %arg0 : i32 to index
    %c2_45 = arith.constant 2 : index
    %55 = memref.load %arg1[%54, %c2_45] : memref<2x8xi32, #tpu.memory_space<smem>>
    %c8_i32_46 = arith.constant 8 : i32
    %56 = arith.cmpi slt, %55, %c8_i32_46 : i32
    %c0_i32_47 = arith.constant 0 : i32
    %c7_i32_48 = arith.constant 7 : i32
    %57 = arith.maxsi %c0_i32_47, %55 : i32
    %58 = arith.minsi %c7_i32_48, %57 : i32
    %c8_i32_49 = arith.constant 8 : i32
    %59 = arith.subi %55, %c8_i32_49 : i32
    %c0_i32_50 = arith.constant 0 : i32
    %c7_i32_51 = arith.constant 7 : i32
    %60 = arith.maxsi %c0_i32_50, %59 : i32
    %61 = arith.minsi %c7_i32_51, %60 : i32
    %62 = arith.index_cast %58 : i32 to index
    %c0_52 = arith.constant 0 : index
    %63 = vector.load %arg4[%62, %c0_52] : memref<8x32xf32, #tpu.memory_space<vmem>>, vector<1x32xf32>
    %c0_53 = arith.constant 0 : index
    %64 = arith.index_cast %61 : i32 to index
    %c0_54 = arith.constant 0 : index
    %65 = vector.load %arg5[%c0_53, %64, %c0_54] : memref<1x8x32xf32, #tpu.memory_space<vmem>>, vector<1x1x32xf32>
    %66 = vector.shape_cast %65 : vector<1x1x32xf32> to vector<1x32xf32>
    %67 = arith.select %56, %63, %66 : vector<1x32xf32>
    %c2_55 = arith.constant 2 : index
    %c0_56 = arith.constant 0 : index
    %68 = vector.load %arg7[%c2_55, %c0_56] : memref<8x32xf32, #tpu.memory_space<vmem>>, vector<1x32xf32>
    tpu.vector_store %arg7[%c2_55, %c0_56], %67 {strides = array<i32>} : memref<8x32xf32, #tpu.memory_space<vmem>>, vector<1x32xf32>,
    %69 = arith.select %56, %0, %2 : vector<1x32xf32>
    %c2_57 = arith.constant 2 : index
    %c0_58 = arith.constant 0 : index
    %70 = vector.load %arg8[%c2_57, %c0_58] : memref<8x32xf32, #tpu.memory_space<vmem>>, vector<1x32xf32>
    tpu.vector_store %arg8[%c2_57, %c0_58], %69 {strides = array<i32>} : memref<8x32xf32, #tpu.memory_space<vmem>>, vector<1x32xf32>,
    %71 = arith.select %56, %1, %3 : vector<1x32xf32>
    %c0_59 = arith.constant 0 : index
    %c2_60 = arith.constant 2 : index
    %c0_61 = arith.constant 0 : index
    %72 = vector.load %arg2[%c0_59, %c2_60, %c0_61] : memref<2x8x32xf32, #tpu.memory_space<vmem>>, vector<1x1x32xf32>
    %73 = vector.shape_cast %72 : vector<1x1x32xf32> to vector<1x32xf32>
    %c1_62 = arith.constant 1 : index
    %c2_63 = arith.constant 2 : index
    %c0_64 = arith.constant 0 : index
    %74 = vector.load %arg2[%c1_62, %c2_63, %c0_64] : memref<2x8x32xf32, #tpu.memory_space<vmem>>, vector<1x1x32xf32>
    %75 = vector.shape_cast %74 : vector<1x1x32xf32> to vector<1x32xf32>
    %76 = arith.select %56, %73, %75 : vector<1x32xf32>
    %77 = arith.addf %71, %76 : vector<1x32xf32>
    %c2_65 = arith.constant 2 : index
    %c0_66 = arith.constant 0 : index
    %78 = vector.load %arg9[%c2_65, %c0_66] : memref<8x32xf32, #tpu.memory_space<vmem>>, vector<1x32xf32>
    tpu.vector_store %arg9[%c2_65, %c0_66], %77 {strides = array<i32>} : memref<8x32xf32, #tpu.memory_space<vmem>>, vector<1x32xf32>,
    %79 = arith.index_cast %arg0 : i32 to index
    %c3_67 = arith.constant 3 : index
    %80 = memref.load %arg1[%79, %c3_67] : memref<2x8xi32, #tpu.memory_space<smem>>
    %c8_i32_68 = arith.constant 8 : i32
    %81 = arith.cmpi slt, %80, %c8_i32_68 : i32
    %c0_i32_69 = arith.constant 0 : i32
    %c7_i32_70 = arith.constant 7 : i32
    %82 = arith.maxsi %c0_i32_69, %80 : i32
    %83 = arith.minsi %c7_i32_70, %82 : i32
    %c8_i32_71 = arith.constant 8 : i32
    %84 = arith.subi %80, %c8_i32_71 : i32
    %c0_i32_72 = arith.constant 0 : i32
    %c7_i32_73 = arith.constant 7 : i32
    %85 = arith.maxsi %c0_i32_72, %84 : i32
    %86 = arith.minsi %c7_i32_73, %85 : i32
    %87 = arith.index_cast %83 : i32 to index
    %c0_74 = arith.constant 0 : index
    %88 = vector.load %arg4[%87, %c0_74] : memref<8x32xf32, #tpu.memory_space<vmem>>, vector<1x32xf32>
    %c0_75 = arith.constant 0 : index
    %89 = arith.index_cast %86 : i32 to index
    %c0_76 = arith.constant 0 : index
    %90 = vector.load %arg5[%c0_75, %89, %c0_76] : memref<1x8x32xf32, #tpu.memory_space<vmem>>, vector<1x1x32xf32>
    %91 = vector.shape_cast %90 : vector<1x1x32xf32> to vector<1x32xf32>
    %92 = arith.select %81, %88, %91 : vector<1x32xf32>
    %c3_77 = arith.constant 3 : index
    %c0_78 = arith.constant 0 : index
    %93 = vector.load %arg7[%c3_77, %c0_78] : memref<8x32xf32, #tpu.memory_space<vmem>>, vector<1x32xf32>
    tpu.vector_store %arg7[%c3_77, %c0_78], %92 {strides = array<i32>} : memref<8x32xf32, #tpu.memory_space<vmem>>, vector<1x32xf32>,
    %94 = arith.select %81, %0, %2 : vector<1x32xf32>
    %c3_79 = arith.constant 3 : index
    %c0_80 = arith.constant 0 : index
    %95 = vector.load %arg8[%c3_79, %c0_80] : memref<8x32xf32, #tpu.memory_space<vmem>>, vector<1x32xf32>
    tpu.vector_store %arg8[%c3_79, %c0_80], %94 {strides = array<i32>} : memref<8x32xf32, #tpu.memory_space<vmem>>, vector<1x32xf32>,
    %96 = arith.select %81, %1, %3 : vector<1x32xf32>
    %c0_81 = arith.constant 0 : index
    %c3_82 = arith.constant 3 : index
    %c0_83 = arith.constant 0 : index
    %97 = vector.load %arg2[%c0_81, %c3_82, %c0_83] : memref<2x8x32xf32, #tpu.memory_space<vmem>>, vector<1x1x32xf32>
    %98 = vector.shape_cast %97 : vector<1x1x32xf32> to vector<1x32xf32>
    %c1_84 = arith.constant 1 : index
    %c3_85 = arith.constant 3 : index
    %c0_86 = arith.constant 0 : index
    %99 = vector.load %arg2[%c1_84, %c3_85, %c0_86] : memref<2x8x32xf32, #tpu.memory_space<vmem>>, vector<1x1x32xf32>
    %100 = vector.shape_cast %99 : vector<1x1x32xf32> to vector<1x32xf32>
    %101 = arith.select %81, %98, %100 : vector<1x32xf32>
    %102 = arith.addf %96, %101 : vector<1x32xf32>
    %c3_87 = arith.constant 3 : index
    %c0_88 = arith.constant 0 : index
    %103 = vector.load %arg9[%c3_87, %c0_88] : memref<8x32xf32, #tpu.memory_space<vmem>>, vector<1x32xf32>
    tpu.vector_store %arg9[%c3_87, %c0_88], %102 {strides = array<i32>} : memref<8x32xf32, #tpu.memory_space<vmem>>, vector<1x32xf32>,
    %104 = arith.index_cast %arg0 : i32 to index
    %c4 = arith.constant 4 : index
    %105 = memref.load %arg1[%104, %c4] : memref<2x8xi32, #tpu.memory_space<smem>>
    %c8_i32_89 = arith.constant 8 : i32
    %106 = arith.cmpi slt, %105, %c8_i32_89 : i32
    %c0_i32_90 = arith.constant 0 : i32
    %c7_i32_91 = arith.constant 7 : i32
    %107 = arith.maxsi %c0_i32_90, %105 : i32
    %108 = arith.minsi %c7_i32_91, %107 : i32
    %c8_i32_92 = arith.constant 8 : i32
    %109 = arith.subi %105, %c8_i32_92 : i32
    %c0_i32_93 = arith.constant 0 : i32
    %c7_i32_94 = arith.constant 7 : i32
    %110 = arith.maxsi %c0_i32_93, %109 : i32
    %111 = arith.minsi %c7_i32_94, %110 : i32
    %112 = arith.index_cast %108 : i32 to index
    %c0_95 = arith.constant 0 : index
    %113 = vector.load %arg4[%112, %c0_95] : memref<8x32xf32, #tpu.memory_space<vmem>>, vector<1x32xf32>
    %c0_96 = arith.constant 0 : index
    %114 = arith.index_cast %111 : i32 to index
    %c0_97 = arith.constant 0 : index
    %115 = vector.load %arg5[%c0_96, %114, %c0_97] : memref<1x8x32xf32, #tpu.memory_space<vmem>>, vector<1x1x32xf32>
    %116 = vector.shape_cast %115 : vector<1x1x32xf32> to vector<1x32xf32>
    %117 = arith.select %106, %113, %116 : vector<1x32xf32>
    %c4_98 = arith.constant 4 : index
    %c0_99 = arith.constant 0 : index
    %118 = vector.load %arg7[%c4_98, %c0_99] : memref<8x32xf32, #tpu.memory_space<vmem>>, vector<1x32xf32>
    tpu.vector_store %arg7[%c4_98, %c0_99], %117 {strides = array<i32>} : memref<8x32xf32, #tpu.memory_space<vmem>>, vector<1x32xf32>,
    %119 = arith.select %106, %0, %2 : vector<1x32xf32>
    %c4_100 = arith.constant 4 : index
    %c0_101 = arith.constant 0 : index
    %120 = vector.load %arg8[%c4_100, %c0_101] : memref<8x32xf32, #tpu.memory_space<vmem>>, vector<1x32xf32>
    tpu.vector_store %arg8[%c4_100, %c0_101], %119 {strides = array<i32>} : memref<8x32xf32, #tpu.memory_space<vmem>>, vector<1x32xf32>,
    %121 = arith.select %106, %1, %3 : vector<1x32xf32>
    %c0_102 = arith.constant 0 : index
    %c4_103 = arith.constant 4 : index
    %c0_104 = arith.constant 0 : index
    %122 = vector.load %arg2[%c0_102, %c4_103, %c0_104] : memref<2x8x32xf32, #tpu.memory_space<vmem>>, vector<1x1x32xf32>
    %123 = vector.shape_cast %122 : vector<1x1x32xf32> to vector<1x32xf32>
    %c1_105 = arith.constant 1 : index
    %c4_106 = arith.constant 4 : index
    %c0_107 = arith.constant 0 : index
    %124 = vector.load %arg2[%c1_105, %c4_106, %c0_107] : memref<2x8x32xf32, #tpu.memory_space<vmem>>, vector<1x1x32xf32>
    %125 = vector.shape_cast %124 : vector<1x1x32xf32> to vector<1x32xf32>
    %126 = arith.select %106, %123, %125 : vector<1x32xf32>
    %127 = arith.addf %121, %126 : vector<1x32xf32>
    %c4_108 = arith.constant 4 : index
    %c0_109 = arith.constant 0 : index
    %128 = vector.load %arg9[%c4_108, %c0_109] : memref<8x32xf32, #tpu.memory_space<vmem>>, vector<1x32xf32>
    tpu.vector_store %arg9[%c4_108, %c0_109], %127 {strides = array<i32>} : memref<8x32xf32, #tpu.memory_space<vmem>>, vector<1x32xf32>,
    %129 = arith.index_cast %arg0 : i32 to index
    %c5 = arith.constant 5 : index
    %130 = memref.load %arg1[%129, %c5] : memref<2x8xi32, #tpu.memory_space<smem>>
    %c8_i32_110 = arith.constant 8 : i32
    %131 = arith.cmpi slt, %130, %c8_i32_110 : i32
    %c0_i32_111 = arith.constant 0 : i32
    %c7_i32_112 = arith.constant 7 : i32
    %132 = arith.maxsi %c0_i32_111, %130 : i32
    %133 = arith.minsi %c7_i32_112, %132 : i32
    %c8_i32_113 = arith.constant 8 : i32
    %134 = arith.subi %130, %c8_i32_113 : i32
    %c0_i32_114 = arith.constant 0 : i32
    %c7_i32_115 = arith.constant 7 : i32
    %135 = arith.maxsi %c0_i32_114, %134 : i32
    %136 = arith.minsi %c7_i32_115, %135 : i32
    %137 = arith.index_cast %133 : i32 to index
    %c0_116 = arith.constant 0 : index
    %138 = vector.load %arg4[%137, %c0_116] : memref<8x32xf32, #tpu.memory_space<vmem>>, vector<1x32xf32>
    %c0_117 = arith.constant 0 : index
    %139 = arith.index_cast %136 : i32 to index
    %c0_118 = arith.constant 0 : index
    %140 = vector.load %arg5[%c0_117, %139, %c0_118] : memref<1x8x32xf32, #tpu.memory_space<vmem>>, vector<1x1x32xf32>
    %141 = vector.shape_cast %140 : vector<1x1x32xf32> to vector<1x32xf32>
    %142 = arith.select %131, %138, %141 : vector<1x32xf32>
    %c5_119 = arith.constant 5 : index
    %c0_120 = arith.constant 0 : index
    %143 = vector.load %arg7[%c5_119, %c0_120] : memref<8x32xf32, #tpu.memory_space<vmem>>, vector<1x32xf32>
    tpu.vector_store %arg7[%c5_119, %c0_120], %142 {strides = array<i32>} : memref<8x32xf32, #tpu.memory_space<vmem>>, vector<1x32xf32>,
    %144 = arith.select %131, %0, %2 : vector<1x32xf32>
    %c5_121 = arith.constant 5 : index
    %c0_122 = arith.constant 0 : index
    %145 = vector.load %arg8[%c5_121, %c0_122] : memref<8x32xf32, #tpu.memory_space<vmem>>, vector<1x32xf32>
    tpu.vector_store %arg8[%c5_121, %c0_122], %144 {strides = array<i32>} : memref<8x32xf32, #tpu.memory_space<vmem>>, vector<1x32xf32>,
    %146 = arith.select %131, %1, %3 : vector<1x32xf32>
    %c0_123 = arith.constant 0 : index
    %c5_124 = arith.constant 5 : index
    %c0_125 = arith.constant 0 : index
    %147 = vector.load %arg2[%c0_123, %c5_124, %c0_125] : memref<2x8x32xf32, #tpu.memory_space<vmem>>, vector<1x1x32xf32>
    %148 = vector.shape_cast %147 : vector<1x1x32xf32> to vector<1x32xf32>
    %c1_126 = arith.constant 1 : index
    %c5_127 = arith.constant 5 : index
    %c0_128 = arith.constant 0 : index
    %149 = vector.load %arg2[%c1_126, %c5_127, %c0_128] : memref<2x8x32xf32, #tpu.memory_space<vmem>>, vector<1x1x32xf32>
    %150 = vector.shape_cast %149 : vector<1x1x32xf32> to vector<1x32xf32>
    %151 = arith.select %131, %148, %150 : vector<1x32xf32>
    %152 = arith.addf %146, %151 : vector<1x32xf32>
    %c5_129 = arith.constant 5 : index
    %c0_130 = arith.constant 0 : index
    %153 = vector.load %arg9[%c5_129, %c0_130] : memref<8x32xf32, #tpu.memory_space<vmem>>, vector<1x32xf32>
    tpu.vector_store %arg9[%c5_129, %c0_130], %152 {strides = array<i32>} : memref<8x32xf32, #tpu.memory_space<vmem>>, vector<1x32xf32>,
    %154 = arith.index_cast %arg0 : i32 to index
    %c6 = arith.constant 6 : index
    %155 = memref.load %arg1[%154, %c6] : memref<2x8xi32, #tpu.memory_space<smem>>
    %c8_i32_131 = arith.constant 8 : i32
    %156 = arith.cmpi slt, %155, %c8_i32_131 : i32
    %c0_i32_132 = arith.constant 0 : i32
    %c7_i32_133 = arith.constant 7 : i32
    %157 = arith.maxsi %c0_i32_132, %155 : i32
    %158 = arith.minsi %c7_i32_133, %157 : i32
    %c8_i32_134 = arith.constant 8 : i32
    %159 = arith.subi %155, %c8_i32_134 : i32
    %c0_i32_135 = arith.constant 0 : i32
    %c7_i32_136 = arith.constant 7 : i32
    %160 = arith.maxsi %c0_i32_135, %159 : i32
    %161 = arith.minsi %c7_i32_136, %160 : i32
    %162 = arith.index_cast %158 : i32 to index
    %c0_137 = arith.constant 0 : index
    %163 = vector.load %arg4[%162, %c0_137] : memref<8x32xf32, #tpu.memory_space<vmem>>, vector<1x32xf32>
    %c0_138 = arith.constant 0 : index
    %164 = arith.index_cast %161 : i32 to index
    %c0_139 = arith.constant 0 : index
    %165 = vector.load %arg5[%c0_138, %164, %c0_139] : memref<1x8x32xf32, #tpu.memory_space<vmem>>, vector<1x1x32xf32>
    %166 = vector.shape_cast %165 : vector<1x1x32xf32> to vector<1x32xf32>
    %167 = arith.select %156, %163, %166 : vector<1x32xf32>
    %c6_140 = arith.constant 6 : index
    %c0_141 = arith.constant 0 : index
    %168 = vector.load %arg7[%c6_140, %c0_141] : memref<8x32xf32, #tpu.memory_space<vmem>>, vector<1x32xf32>
    tpu.vector_store %arg7[%c6_140, %c0_141], %167 {strides = array<i32>} : memref<8x32xf32, #tpu.memory_space<vmem>>, vector<1x32xf32>,
    %169 = arith.select %156, %0, %2 : vector<1x32xf32>
    %c6_142 = arith.constant 6 : index
    %c0_143 = arith.constant 0 : index
    %170 = vector.load %arg8[%c6_142, %c0_143] : memref<8x32xf32, #tpu.memory_space<vmem>>, vector<1x32xf32>
    tpu.vector_store %arg8[%c6_142, %c0_143], %169 {strides = array<i32>} : memref<8x32xf32, #tpu.memory_space<vmem>>, vector<1x32xf32>,
    %171 = arith.select %156, %1, %3 : vector<1x32xf32>
    %c0_144 = arith.constant 0 : index
    %c6_145 = arith.constant 6 : index
    %c0_146 = arith.constant 0 : index
    %172 = vector.load %arg2[%c0_144, %c6_145, %c0_146] : memref<2x8x32xf32, #tpu.memory_space<vmem>>, vector<1x1x32xf32>
    %173 = vector.shape_cast %172 : vector<1x1x32xf32> to vector<1x32xf32>
    %c1_147 = arith.constant 1 : index
    %c6_148 = arith.constant 6 : index
    %c0_149 = arith.constant 0 : index
    %174 = vector.load %arg2[%c1_147, %c6_148, %c0_149] : memref<2x8x32xf32, #tpu.memory_space<vmem>>, vector<1x1x32xf32>
    %175 = vector.shape_cast %174 : vector<1x1x32xf32> to vector<1x32xf32>
    %176 = arith.select %156, %173, %175 : vector<1x32xf32>
    %177 = arith.addf %171, %176 : vector<1x32xf32>
    %c6_150 = arith.constant 6 : index
    %c0_151 = arith.constant 0 : index
    %178 = vector.load %arg9[%c6_150, %c0_151] : memref<8x32xf32, #tpu.memory_space<vmem>>, vector<1x32xf32>
    tpu.vector_store %arg9[%c6_150, %c0_151], %177 {strides = array<i32>} : memref<8x32xf32, #tpu.memory_space<vmem>>, vector<1x32xf32>,
    %179 = arith.index_cast %arg0 : i32 to index
    %c7 = arith.constant 7 : index
    %180 = memref.load %arg1[%179, %c7] : memref<2x8xi32, #tpu.memory_space<smem>>
    %c8_i32_152 = arith.constant 8 : i32
    %181 = arith.cmpi slt, %180, %c8_i32_152 : i32
    %c0_i32_153 = arith.constant 0 : i32
    %c7_i32_154 = arith.constant 7 : i32
    %182 = arith.maxsi %c0_i32_153, %180 : i32
    %183 = arith.minsi %c7_i32_154, %182 : i32
    %c8_i32_155 = arith.constant 8 : i32
    %184 = arith.subi %180, %c8_i32_155 : i32
    %c0_i32_156 = arith.constant 0 : i32
    %c7_i32_157 = arith.constant 7 : i32
    %185 = arith.maxsi %c0_i32_156, %184 : i32
    %186 = arith.minsi %c7_i32_157, %185 : i32
    %187 = arith.index_cast %183 : i32 to index
    %c0_158 = arith.constant 0 : index
    %188 = vector.load %arg4[%187, %c0_158] : memref<8x32xf32, #tpu.memory_space<vmem>>, vector<1x32xf32>
    %c0_159 = arith.constant 0 : index
    %189 = arith.index_cast %186 : i32 to index
    %c0_160 = arith.constant 0 : index
    %190 = vector.load %arg5[%c0_159, %189, %c0_160] : memref<1x8x32xf32, #tpu.memory_space<vmem>>, vector<1x1x32xf32>
    %191 = vector.shape_cast %190 : vector<1x1x32xf32> to vector<1x32xf32>
    %192 = arith.select %181, %188, %191 : vector<1x32xf32>
    %c7_161 = arith.constant 7 : index
    %c0_162 = arith.constant 0 : index
    %193 = vector.load %arg7[%c7_161, %c0_162] : memref<8x32xf32, #tpu.memory_space<vmem>>, vector<1x32xf32>
    tpu.vector_store %arg7[%c7_161, %c0_162], %192 {strides = array<i32>} : memref<8x32xf32, #tpu.memory_space<vmem>>, vector<1x32xf32>,
    %194 = arith.select %181, %0, %2 : vector<1x32xf32>
    %c7_163 = arith.constant 7 : index
    %c0_164 = arith.constant 0 : index
    %195 = vector.load %arg8[%c7_163, %c0_164] : memref<8x32xf32, #tpu.memory_space<vmem>>, vector<1x32xf32>
    tpu.vector_store %arg8[%c7_163, %c0_164], %194 {strides = array<i32>} : memref<8x32xf32, #tpu.memory_space<vmem>>, vector<1x32xf32>,
    %196 = arith.select %181, %1, %3 : vector<1x32xf32>
    %c0_165 = arith.constant 0 : index
    %c7_166 = arith.constant 7 : index
    %c0_167 = arith.constant 0 : index
    %197 = vector.load %arg2[%c0_165, %c7_166, %c0_167] : memref<2x8x32xf32, #tpu.memory_space<vmem>>, vector<1x1x32xf32>
    %198 = vector.shape_cast %197 : vector<1x1x32xf32> to vector<1x32xf32>
    %c1_168 = arith.constant 1 : index
    %c7_169 = arith.constant 7 : index
    %c0_170 = arith.constant 0 : index
    %199 = vector.load %arg2[%c1_168, %c7_169, %c0_170] : memref<2x8x32xf32, #tpu.memory_space<vmem>>, vector<1x1x32xf32>
    %200 = vector.shape_cast %199 : vector<1x1x32xf32> to vector<1x32xf32>
    %201 = arith.select %181, %198, %200 : vector<1x32xf32>
    %202 = arith.addf %196, %201 : vector<1x32xf32>
    %c7_171 = arith.constant 7 : index
    %c0_172 = arith.constant 0 : index
    %203 = vector.load %arg9[%c7_171, %c0_172] : memref<8x32xf32, #tpu.memory_space<vmem>>, vector<1x32xf32>
    tpu.vector_store %arg9[%c7_171, %c0_172], %202 {strides = array<i32>} : memref<8x32xf32, #tpu.memory_space<vmem>>, vector<1x32xf32>,
    %c0_173 = arith.constant 0 : index
    %c0_174 = arith.constant 0 : index
    %204 = vector.load %arg7[%c0_173, %c0_174] : memref<8x32xf32, #tpu.memory_space<vmem>>, vector<8x32xf32>
    %cst = arith.constant dense<0.000000e+00> : vector<8xf32>
    %205 = vector.multi_reduction <add>, %204, %cst [1] : vector<8x32xf32> to vector<8xf32>
    %206 = vector.shape_cast %205 : vector<8xf32> to vector<8x1xf32>
    %cst_175 = arith.constant 3.200000e+01 : f32
    %207 = vector.broadcast %cst_175 : f32 to vector<8x1xf32>
    %208 = arith.divf %206, %207 : vector<8x1xf32>
    %209 = vector.broadcast %208 : vector<8x1xf32> to vector<8x32xf32>
    %210 = arith.subf %204, %209 : vector<8x32xf32>
    %211 = arith.mulf %210, %210 : vector<8x32xf32>
    %cst_176 = arith.constant dense<0.000000e+00> : vector<8xf32>
    %212 = vector.multi_reduction <add>, %211, %cst_176 [1] : vector<8x32xf32> to vector<8xf32>
    %213 = vector.shape_cast %212 : vector<8xf32> to vector<8x1xf32>
    %cst_177 = arith.constant 3.200000e+01 : f32
    %214 = vector.broadcast %cst_177 : f32 to vector<8x1xf32>
    %215 = arith.divf %213, %214 : vector<8x1xf32>
    %216 = vector.broadcast %208 : vector<8x1xf32> to vector<8x32xf32>
    %217 = arith.subf %204, %216 : vector<8x32xf32>
    %cst_178 = arith.constant 9.99999996E-13 : f32
    %218 = vector.broadcast %cst_178 : f32 to vector<8x1xf32>
    %219 = arith.addf %215, %218 : vector<8x1xf32>
    %220 = math.rsqrt %219 : vector<8x1xf32>
    %221 = vector.broadcast %220 : vector<8x1xf32> to vector<8x32xf32>
    %222 = arith.mulf %217, %221 : vector<8x32xf32>
    %c0_179 = arith.constant 0 : index
    %c0_180 = arith.constant 0 : index
    %223 = vector.load %arg8[%c0_179, %c0_180] : memref<8x32xf32, #tpu.memory_space<vmem>>, vector<8x32xf32>
    %224 = arith.mulf %222, %223 : vector<8x32xf32>
    %c0_181 = arith.constant 0 : index
    %c0_182 = arith.constant 0 : index
    %225 = vector.load %arg9[%c0_181, %c0_182] : memref<8x32xf32, #tpu.memory_space<vmem>>, vector<8x32xf32>
    %226 = arith.addf %224, %225 : vector<8x32xf32>
    %c0_183 = arith.constant 0 : index
    %c0_184 = arith.constant 0 : index
    %c0_185 = arith.constant 0 : index
    %227 = vector.load %arg6[%c0_183, %c0_184, %c0_185] : memref<1x8x32xf32, #tpu.memory_space<vmem>>, vector<1x8x32xf32>
    %228 = vector.shape_cast %227 : vector<1x8x32xf32> to vector<8x32xf32>
    %229 = vector.shape_cast %226 : vector<8x32xf32> to vector<1x8x32xf32>
    tpu.vector_store %arg6[%c0_183, %c0_184, %c0_185], %229 {strides = array<i32>} : memref<1x8x32xf32, #tpu.memory_space<vmem>>, vector<1x8x32xf32>,
    return
  }
  func.func @transform_0(%arg0: i32, %arg1: memref<2x8xi32, #tpu.memory_space<smem>>) -> (i32, i32, i32) {
    %c0_i32 = arith.constant 0 : i32
    %c0_i32_0 = arith.constant 0 : i32
    %c0_i32_1 = arith.constant 0 : i32
    %c0_i32_2 = arith.constant 0 : i32
    return %c0_i32, %c0_i32_0, %c0_i32_1 : i32, i32, i32
  }
  func.func @transform_1(%arg0: i32, %arg1: memref<2x8xi32, #tpu.memory_space<smem>>) -> (i32, i32) {
    %c0_i32 = arith.constant 0 : i32
    %c0_i32_0 = arith.constant 0 : i32
    %c0_i32_1 = arith.constant 0 : i32
    return %c0_i32, %c0_i32_0 : i32, i32
  }
  func.func @transform_2(%arg0: i32, %arg1: memref<2x8xi32, #tpu.memory_space<smem>>) -> (i32, i32) {
    %c0_i32 = arith.constant 0 : i32
    %c0_i32_0 = arith.constant 0 : i32
    %c0_i32_1 = arith.constant 0 : i32
    return %c0_i32, %c0_i32_0 : i32, i32
  }
  func.func @transform_3(%arg0: i32, %arg1: memref<2x8xi32, #tpu.memory_space<smem>>) -> (i32, i32, i32) {
    %c0_i32 = arith.constant 0 : i32
    %c0_i32_0 = arith.constant 0 : i32
    %c0_i32_1 = arith.constant 0 : i32
    return %arg0, %c0_i32, %c0_i32_0 : i32, i32, i32
  }
  func.func @transform_4(%arg0: i32, %arg1: memref<2x8xi32, #tpu.memory_space<smem>>) -> (i32, i32, i32) {
    %c0_i32 = arith.constant 0 : i32
    %c0_i32_0 = arith.constant 0 : i32
    %c0_i32_1 = arith.constant 0 : i32
    return %arg0, %c0_i32, %c0_i32_0 : i32, i32, i32
  }
}

</mosaic_0001>

<bundles_post_ra>
// kernel: tpu_custom_call.1
= control target key start
LH: loop header
LB: loop body
LE: loop exit
PB: predicated region body
PF: predicated region fallthrough
CT: control target
= control target key end

     0   :  { %s1469_s0 = inlined_call_operand.hbm [shape: s32[2,8], index: 0, kind: input, shape index: {}]   ;;  %s1470_s1 = inlined_call_operand.hbm [shape: f32[2,8,32], index: 1, kind: input, shape index: {}]   ;;  %s1471_s2 = inlined_call_operand.hbm [shape: f32[4,32], index: 2, kind: input, shape index: {}]   ;;  %s1472_s3 = inlined_call_operand.vmem [shape: f32[8,32], index: 3, kind: input, shape index: {}]   ;;  %s1473_s4 = inlined_call_operand.hbm [shape: f32[2,8,32], index: 4, kind: input, shape index: {}]   ;;  %s1474_s5 = inlined_call_operand.hbm [shape: f32[2,8,32], index: 5, kind: output, shape index: {}]  }
   0x1   :  { %s830_s20 = scalar_lea.hbm %s1469_s0, 32 }
   0x2   :  { %p831_p0 = scmp.ne.s32.totalorder %s1469_s0, %s830_s20  ;;  %p834_p1 = scmp.lt.u32.totalorder %s830_s20, %s1469_s0 }
   0x4   :  { %p836_p2 = pnand %p834_p1, %p831_p0 }
   0x6   :  { %839 = shalt.err (!%p836_p2)  }
   0x7   :  { %s1004_s25 = smov [#allocation6]  }
   0x8   :  { %11 = dma.hbm_to_smem %s1469_s0, 32, %s1004_s25, [#allocation5] }
   0x9   :  { %970 = dma.done.wait [#allocation5], 32 }
   0xa   :  { %971 = vsyncadd [#allocation5], 4294967264 }
   0xb   :  { %13 = sfence }
   0xc   :  { %14 = vsyncpa [#allocation8], 0 }
   0xd   :  { %15 = vsyncpa [#allocation11], 0 }
   0xe   :  { %16 = vsyncpa [#allocation9], 0 }
   0xf   :  { %18 = vsyncpa [#allocation9 + $0x1], 0  ;;  %s1053_s28 = smov 0   ;;  %s1055_s29 = smov 0  }
  0x10   :  { %s1057_s30 = smov 0   ;;  %s1059_s6 = smov 0  }
  0x11 LB: > { %s1074_s0 = sadd.s32 4294967295, %s1002_s6   ;;  %s621_s7 = sadd.s32 4294967294, %s1002_s6   ;;  %s1002_s6 = sphi %s1059_s6, %s1496_s6   ;;  %s998_s30 = sphi %s1057_s30, %s1495_s30   ;;  %s994_s29 = sphi %s1055_s29, %s1494_s29   ;;  %s990_s28 = sphi %s1053_s28, %s1493_s28  }
  0x12   : > { %p107_p3 = scmp.ne.s32.totalorder %s994_s29, %s990_s28  ;;  %p1475_p4 = scmp.eq.s32.totalorder %s1074_s0, 0 }
  0x13   : > { %p137_p6 = scmp.eq.s32.totalorder %s621_s7, 1  ;;  %p622_p8 = scmp.ge.s32.totalorder %s1002_s6, 1 }
  0x14   : > { %p1083_p7 = por %p1475_p4, %p107_p3  ;;  %p144_p10 = scmp.lt.s32.totalorder %s1002_s6, 3 }
  0x15   : > { %p1088_p9 = por %p137_p6, %p107_p3  ;;  %s1005_s11 = smov [#allocation7]  }
  0x16   : > { %s1478_s8 = scalar_select %p1083_p7, 1, 0 }
  0x17   : > { %s1479_s9 = scalar_select %p1088_p9, 1, 0 }
  0x18   : > { %p1093_p11 = pnand %p622_p8, %p144_p10  ;;  %s156_s12 = sshll.u32 %s1005_s11, 4  ;;  %s1097_s12 = int_to_ptr.vmem [resolvable:$true] %s156_s12 }
  0x19   : > { %s1006_s14 = smov [#allocation10]   ;;  %s840_s18 = scalar_lea.hbm %s1470_s1, 256 }
  0x1a   : > { %p770_p12 = pneg %p1093_p11  ;;  %s170_s15 = sshll.u32 %s1006_s14, 4  ;;  %s1108_s15 = int_to_ptr.vmem [resolvable:$true] %s170_s15 }
  0x1b   : > { %p841_p1 = scmp.ne.s32.totalorder %s1470_s1, %s840_s18  ;;  %p847_p8 = scmp.lt.u32.totalorder %s840_s18, %s1470_s1 }
  0x1c   : > { %p1104_p0 = pnand %p770_p12, %p1475_p4 }
  0x1e   : > { %p842_p2 = pneg %p1104_p0 }
  0x20   : > { %p843_p3 = pnand %p842_p2, %p841_p1 }
  0x22   : > { %p844_p6 = pneg %p843_p3 }
  0x24   : > { %p849_p10 = pnand %p847_p8, %p844_p6 }
  0x26   : > { %852 = shalt.err (!%p849_p10)
}
  0x27   : > { %s853_s23 = scalar_lea.vmem %s1097_s12, 256  ;;  %p861_p5 = scmp.lt.s32.totalorder %s1097_s12, %s1097_s12 }
  0x28   : > { %p854_p12 = scmp.ne.s32.totalorder %s1097_s12, %s853_s23  ;;  %p862_p1 = scmp.lt.s32.totalorder %s853_s23, %s853_s23 }
  0x2a   : > { %p856_p13 = pnand %p854_p12, %p842_p2  ;;  %p863_p3 = por %p862_p1, %p861_p5 }
  0x2c   : > { %p857_p4 = pneg %p856_p13 }
  0x2e   : > { %p864_p9 = pnand %p863_p3, %p857_p4 }
  0x30   : > { %867 = shalt.err (!%p864_p9)
}
  0x31   : > { %s1007_s24 = smov 128   ;;  %s1008_s25 = smov 8  }
  0x32   : > { %773 = dma.hbm_to_vmem [thread:$0]  (!%p1104_p0), %s1470_s1, 256, %s1097_s12, [#allocation8], %s1007_s24, %s1007_s24, %s1008_s25  }
  0x33   : > { %s868_s14 = scalar_lea.hbm %s1471_s2, 64 }
  0x34   : > { %p869_p5 = scmp.ne.s32.totalorder %s1471_s2, %s868_s14  ;;  %p875_p13 = scmp.lt.u32.totalorder %s868_s14, %s1471_s2 }
  0x36   : > { %p871_p4 = pnand %p869_p5, %p842_p2 }
  0x38   : > { %p872_p9 = pneg %p871_p4 }
  0x3a   : > { %p877_p6 = pnand %p875_p13, %p872_p9 }
  0x3c   : > { %880 = shalt.err (!%p877_p6)
}
  0x3d   : > { %s881_s12 = scalar_lea.vmem %s1108_s15, 64  ;;  %p889_p1 = scmp.lt.s32.totalorder %s1108_s15, %s1108_s15 }
  0x3e   : > { %p882_p8 = scmp.ne.s32.totalorder %s1108_s15, %s881_s12  ;;  %p890_p3 = scmp.lt.s32.totalorder %s881_s12, %s881_s12 }
  0x40   : > { %p884_p10 = pnand %p882_p8, %p842_p2  ;;  %p891_p5 = por %p890_p3, %p889_p1 }
  0x42   : > { %p885_p12 = pneg %p884_p10 }
  0x44   : > { %p892_p4 = pnand %p891_p5, %p885_p12 }
  0x46   : > { %895 = shalt.err (!%p892_p4)
}
  0x47   : > { %776 = dma.hbm_to_vmem [thread:$0]  (!%p1104_p0), %s1471_s2, 64, %s1108_s15, [#allocation11]  }
  0x48   : > { %s1163_s22 = sadd.s32 1, %s1002_s6   ;;  %s94_s13 = sadd.s32 1, %s998_s30 }
  0x49   : > { %s91_s23 = ssub.s32 %s1002_s6, %s1163_s22  ;;  %p101_p2 = scmp.ne.s32.totalorder %s998_s30, %s994_s29 }
  0x4a   : > { %p92_p9 = scmp.eq.s32.totalorder %s91_s23, 0  ;;  %p102_p13 = scmp.eq.s32.totalorder %s1002_s6, 0 }
  0x4b   : > { %p1482_p6 = scmp.eq.s32.totalorder %s1074_s0, 1  ;;  %p787_p10 = scmp.lt.s32.totalorder %s1002_s6, 2 }
  0x4c   : > { %s1179_s25 = scalar_select %p92_p9, %s998_s30, %s94_s13  }
  0x4d   : > { %p1173_p8 = por %p1482_p6, %p101_p2  ;;  %p103_p12 = por %p102_p13, %p101_p2 }
  0x4e   : > { %s184_s26 = sand.u32 1, %s1002_s6   ;;  %s186_s27 = sand.u32 1, %s998_s30  }
  0x4f   : > { %s1483_s24 = scalar_select %p1173_p8, 1, 0 }
  0x50   : > { %s626_s15 = sshll.u32 %s186_s27, 3  ;;  %s627_s7 = sshll.u32 %s1002_s6, 7 }
  0x51   : > { %s1187_s16 = scalar_lea.hbm %s1473_s4, %s627_s7  ;;  %s188_s17 = scalar_lea.vmem [#allocation12], %s626_s15 }
  0x52   : > { %s195_s18 = sshll.u32 %s188_s17, 4  ;;  %p1189_p0 = pnand %p787_p10, %p103_p12  ;;  %s1193_s18 = int_to_ptr.vmem [resolvable:$true] %s195_s18 }
  0x53   : > { %s185_s12 = scalar_lea.sflag [#allocation8], %s184_s26  ;;  %s896_s20 = scalar_lea.hbm %s1187_s16, 128 }
  0x54   : > { %p897_p1 = scmp.ne.s32.totalorder %s1187_s16, %s896_s20  ;;  %p898_p3 = pneg %p1189_p0 }
  0x55   : > { %s901_s23 = scalar_lea.hbm %s1473_s4, 256  ;;  %p902_p2 = scmp.lt.u32.totalorder %s1187_s16, %s1473_s4 }
  0x56   : > { %p899_p5 = pnand %p898_p3, %p897_p1  ;;  %p903_p9 = scmp.lt.u32.totalorder %s901_s23, %s896_s20 }
  0x57   : > { %p905_p6 = scmp.lt.u32.totalorder %s896_s20, %s1187_s16 }
  0x58   : > { %p900_p4 = pneg %p899_p5  ;;  %p904_p13 = por %p903_p9, %p902_p2 }
  0x5a   : > { %p906_p10 = por %p905_p6, %p904_p13 }
  0x5c   : > { %p907_p12 = pnand %p906_p10, %p900_p4 }
  0x5e   : > { %910 = shalt.err (!%p907_p12)
}
  0x5f   : > { %s911_s26 = scalar_lea.vmem %s1193_s18, 128  ;;  %s1009_s7 = smov [#allocation12]  }
  0x60   : > { %p912_p1 = scmp.ne.s32.totalorder %s1193_s18, %s911_s26  ;;  %s916_s11 = sshll.u32 %s1009_s7, 4  ;;  %s917_s11 = int_to_ptr.vmem [resolvable:$false] %s916_s11 }
  0x61   : > { %s918_s14 = scalar_lea.vmem %s917_s11, 256  ;;  %p919_p7 = scmp.lt.s32.totalorder %s1193_s18, %s917_s11 }
  0x62   : > { %p914_p5 = pnand %p912_p1, %p898_p3  ;;  %p920_p2 = scmp.lt.s32.totalorder %s918_s14, %s911_s26 }
  0x64   : > { %p915_p8 = pneg %p914_p5  ;;  %p921_p9 = por %p920_p2, %p919_p7 }
  0x66   : > { %p922_p13 = pnand %p921_p9, %p915_p8 }
  0x68   : > { %925 = shalt.err (!%p922_p13)
}
  0x69   : > { %780 = dma.hbm_to_vmem [thread:$0]  (!%p1189_p0), %s1187_s16, 128, %s1193_s18, %s185_s12  }
  0x6a   : > { %204 = sbr.rel (%p1093_p11) target bundleno = 531 (0x213), region = 36  ;;  %p1485_p3 = scmp.eq.s32.totalorder (!%p1093_p11), %s1074_s0, 0 }
  0x71   : > { %973 = dma.done.wait (%p1485_p3), [#allocation8], 256   ;;  %p1486_p4 = pmov %p1485_p3 }
  0x72   : > { %p1487_p6 = pmov %p1485_p3 }
  0x73   : > { %975 = vsyncadd (%p1486_p4), [#allocation8], 4294967040 }
  0x74   : > { %977 = dma.done.wait (%p1487_p6), [#allocation11], 64   ;;  %p1488_p7 = pmov %p1485_p3 }
  0x75   : > { %s214_s16 = sand.u32 1, %s1074_s0   ;;  %s216_s17 = sand.u32 1, %s994_s29  }
  0x76   : > { %979 = vsyncadd (%p1488_p7), [#allocation11], 4294967232  ;;  %s1234_s10 = sshll.u32 %s216_s17, 3  ;;  %s215_s18 = scalar_lea.sflag [#allocation8], %s214_s16 }
  0x77   : > { %s1237_s19 = scalar_lea.vmem [#allocation12], %s1234_s10  ;;  %p1489_p11 = scmp.ne.s32.totalorder %s1478_s8, 0 }
  0x79   : > { %981 = dma.done.wait (%p1489_p11), %s215_s18, 128  }
  0x7a   : > { %983 = vsyncadd (%p1489_p11), %s215_s18, 4294967168  ;;  %s1244_s12 = sshll.u32 %s1074_s0, 7  ;;  %v272_v0 = vld [vmem:[#allocation7] sm:$0x1]  ;;  %v274_v1 = vld [vmem:[#allocation7 + $0x8] sm:$0x1] }
  0x7b   : > { %s248_s20 = sld [smem:[#allocation6 + %s1244_s12]]  ;;  %s278_s21 = sadd.s32 1, %s1244_s12  ;;  %v1268_v3 = vld [vmem:[#allocation10] sm:$0x1]  ;;  %vm267_vm0 = vcmask 253952   ;;  %vm482_vm9 = vcmask 261120  }
  0x7c   : > { %s1248_s13 = sld [smem:[#allocation6 + %s278_s21]]  ;;  %s307_s23 = sadd.s32 2, %s1244_s12  ;;  %v1272_v4 = vld [vmem:[#allocation10 + $0x1] sm:$0x1]  ;;  %v1274_v5 = vld [vmem:[#allocation10 + $0x2] sm:$0x1] }
  0x7d   : > { %s1251_s27 = sld [smem:[#allocation6 + %s307_s23]]  ;;  %s336_s15 = sadd.s32 3, %s1244_s12  ;;  %v1278_v8 = vld [vmem:[#allocation10 + $0x3] sm:$0x1]  ;;  %v302_v14 = vld [vmem:[#allocation7 + $0x1] sm:$0x1] }
  0x7e   : > { %s1254_s8 = sld [smem:[#allocation6 + %s336_s15]]  ;;  %s365_s0 = sadd.s32 4, %s1244_s12  ;;  %v303_v16 = vld [vmem:[#allocation7 + $0x9] sm:$0x1]  ;;  %v331_v24 = vld [vmem:[#allocation7 + $0x2] sm:$0x1] }
  0x7f   : > { %s1257_s26 = sld [smem:[#allocation6 + %s365_s0]]  ;;  %s394_s7 = sadd.s32 5, %s1244_s12  ;;  %v332_v26 = vld [vmem:[#allocation7 + $0xa] sm:$0x1]  ;;  %v360_v34 = vld [vmem:[#allocation7 + $0x3] sm:$0x1] }
  0x80   : > { %s1260_s11 = sld [smem:[#allocation6 + %s394_s7]]  ;;  %s423_s14 = sadd.s32 6, %s1244_s12  ;;  %v361_v36 = vld [vmem:[#allocation7 + $0xb] sm:$0x1]  ;;  %v389_v44 = vld [vmem:[#allocation7 + $0x4] sm:$0x1] }
  0x81   : > { %p249_p8 = scmp.lt.s32.totalorder %s248_s20, 8  ;;  %p250_p0 = scmp.gt.s32.totalorder %s248_s20, 0  ;;  %v390_v46 = vld [vmem:[#allocation7 + $0xc] sm:$0x1]  ;;  %v418_v54 = vld [vmem:[#allocation7 + $0x5] sm:$0x1] }
  0x82   : > { %p634_p10 = scmp.lt.s32.totalorder %s248_s20, 7  ;;  %s639_s16 = sadd.s32 4294967288, %s248_s20  ;;  %v419_v56 = vld [vmem:[#allocation7 + $0xd] sm:$0x1] }
  0x83   : > { %s251_s18 = scalar_select %p250_p0, %s248_s20, 0 }
  0x84   : > { %p255_p12 = scmp.gt.s32.totalorder %s639_s16, 0  ;;  %p640_p1 = scmp.lt.s32.totalorder %s639_s16, 7 }
  0x85   : > { %s1498_s18 = smov (!%p634_p10, %s251_s18), 7  ;;  %p280_p5 = scmp.lt.s32.totalorder %s1248_s13, 8 }
  0x86   : > { %s1500_s16 = smov (!%p255_p12, %s639_s16), 0  ;;  %s259_s15 = scalar_lea.vmem %s1472_s3, %s1498_s18 }
  0x87   : > { %s1502_s16 = smov (!%p640_p1, %s1500_s16), 7  ;;  %v260_v2 = vld [vmem:[%s259_s15] sm:$0x1]  ;;  %p281_p2 = scmp.gt.s32.totalorder %s1248_s13, 0 }
  0x88   : > { %s263_s0 = scalar_select %p249_p8, 1, 0 }
  0x89   : > { %s261_s7 = scalar_lea.vmem %s1237_s19, %s1502_s16 [#allocation12]  ;;  %p645_p9 = scmp.lt.s32.totalorder %s1248_s13, 7 }
  0x8a   : > { %v262_v6 = vld [vmem:[%s261_s7] sm:$0x1]  ;;  %v264_v7 = vstv %s263_s0  ;;  %s650_s18 = sadd.s32 4294967288, %s1248_s13  ;;  %p309_p4 = scmp.lt.s32.totalorder %s1251_s27, 8 }
  0x8b   : > { %vm265_vm1 = vcmp.eq.s32.totalorder %v264_v7, 1  ;;  %s282_s21 = scalar_select %p281_p2, %s1248_s13, 0 }
  0x8c   : > { %v266_v9 = vsel %vm265_vm1, %v260_v2, %v262_v6  ;;  %v275_v10 = vsel %vm265_vm1, %v272_v0, %v274_v1  ;;  %p286_p13 = scmp.gt.s32.totalorder %s650_s18, 0  ;;  %p651_p3 = scmp.lt.s32.totalorder %s650_s18, 7  ;;  %v269_v11 = vsel %vm265_vm1, %v1268_v3, %v1274_v5  ;;  %v271_v12 = vsel %vm265_vm1, %v1272_v4, %v1278_v8  ;;  %v447_v0 = vld [vmem:[#allocation7 + $0x6] sm:$0x1]  ;;  %v448_v2 = vld [vmem:[#allocation7 + $0xe] sm:$0x1] }
  0x8d   : > { %268 = vst.msk [vmem:[#allocation2] sm:$0x1] %vm267_vm0, %v266_v9  ;;  %s1504_s21 = smov (!%p645_p9, %s282_s21), 7  ;;  %270 = vst.msk [vmem:[#allocation3] sm:$0x1] %vm267_vm0, %v269_v11  ;;  %v276_v13 = vadd.f32 %v275_v10, %v271_v12  ;;  %p310_p6 = scmp.gt.s32.totalorder %s1251_s27, 0 }
  0x8e   : > { %s1506_s18 = smov (!%p286_p13, %s650_s18), 0  ;;  %s290_s23 = scalar_lea.vmem %s1472_s3, %s1504_s21 }
  0x8f   : > { %277 = vst.msk [vmem:[#allocation4] sm:$0x1] %vm267_vm0, %v276_v13  ;;  %s1508_s18 = smov (!%p651_p3, %s1506_s18), 7  ;;  %v291_v15 = vld [vmem:[%s290_s23] sm:$0x1]  ;;  %p656_p7 = scmp.lt.s32.totalorder %s1251_s27, 7 }
  0x90   : > { %s294_s15 = scalar_select %p280_p5, 1, 0 }
  0x91   : > { %s292_s0 = scalar_lea.vmem %s1237_s19, %s1508_s18 [#allocation12]  ;;  %s661_s7 = sadd.s32 4294967288, %s1251_s27 }
  0x92   : > { %v293_v17 = vld [vmem:[%s292_s0] sm:$0x1]  ;;  %v295_v18 = vstv %s294_s15  ;;  %s311_s20 = scalar_select %p310_p6, %s1251_s27, 0 }
  0x93   : > { %vm296_vm2 = vcmp.eq.s32.totalorder %v295_v18, 1  ;;  %p315_p11 = scmp.gt.s32.totalorder %s661_s7, 0  ;;  %p662_p8 = scmp.lt.s32.totalorder %s661_s7, 7 }
  0x94   : > { %v297_v19 = vsel %vm296_vm2, %v291_v15, %v293_v17  ;;  %v304_v20 = vsel %vm296_vm2, %v302_v14, %v303_v16  ;;  %v299_v21 = vsel %vm296_vm2, %v1268_v3, %v1274_v5  ;;  %v301_v22 = vsel %vm296_vm2, %v1272_v4, %v1278_v8  ;;  %s1510_s20 = smov (!%p656_p7, %s311_s20), 7  ;;  %p338_p0 = scmp.lt.s32.totalorder %s1254_s8, 8  ;;  %v476_v15 = vld [vmem:[#allocation7 + $0x7] sm:$0x1]  ;;  %v477_v16 = vld [vmem:[#allocation7 + $0xf] sm:$0x1] }
  0x95   : > { %298 = vst.msk [vmem:[#allocation2 + $0x1] sm:$0x1] %vm267_vm0, %v297_v19  ;;  %300 = vst.msk [vmem:[#allocation3 + $0x1] sm:$0x1] %vm267_vm0, %v299_v21  ;;  %v305_v23 = vadd.f32 %v304_v20, %v301_v22  ;;  %s1512_s7 = smov (!%p315_p11, %s661_s7), 0  ;;  %s319_s21 = scalar_lea.vmem %s1472_s3, %s1510_s20 }
  0x96   : > { %s1514_s7 = smov (!%p662_p8, %s1512_s7), 7  ;;  %v320_v25 = vld [vmem:[%s319_s21] sm:$0x1]  ;;  %p339_p10 = scmp.gt.s32.totalorder %s1254_s8, 0 }
  0x97   : > { %306 = vst.msk [vmem:[#allocation4 + $0x1] sm:$0x1] %vm267_vm0, %v305_v23  ;;  %s323_s16 = scalar_select %p309_p4, 1, 0 }
  0x98   : > { %s321_s23 = scalar_lea.vmem %s1237_s19, %s1514_s7 [#allocation12]  ;;  %p667_p12 = scmp.lt.s32.totalorder %s1254_s8, 7 }
  0x99   : > { %v322_v27 = vld [vmem:[%s321_s23] sm:$0x1]  ;;  %v324_v28 = vstv %s323_s16  ;;  %s672_s15 = sadd.s32 4294967288, %s1254_s8  ;;  %p367_p2 = scmp.lt.s32.totalorder %s1257_s26, 8 }
  0x9a   : > { %vm325_vm3 = vcmp.eq.s32.totalorder %v324_v28, 1  ;;  %s340_s0 = scalar_select %p339_p10, %s1254_s8, 0 }
  0x9b   : > { %v326_v29 = vsel %vm325_vm3, %v320_v25, %v322_v27  ;;  %v333_v30 = vsel %vm325_vm3, %v331_v24, %v332_v26  ;;  %p344_p1 = scmp.gt.s32.totalorder %s672_s15, 0  ;;  %p673_p5 = scmp.lt.s32.totalorder %s672_s15, 7  ;;  %v328_v31 = vsel %vm325_vm3, %v1268_v3, %v1274_v5  ;;  %v330_v32 = vsel %vm325_vm3, %v1272_v4, %v1278_v8 }
  0x9c   : > { %327 = vst.msk [vmem:[#allocation2 + $0x2] sm:$0x1] %vm267_vm0, %v326_v29  ;;  %s1516_s0 = smov (!%p667_p12, %s340_s0), 7  ;;  %329 = vst.msk [vmem:[#allocation3 + $0x2] sm:$0x1] %vm267_vm0, %v328_v31  ;;  %v334_v33 = vadd.f32 %v333_v30, %v330_v32  ;;  %p368_p9 = scmp.gt.s32.totalorder %s1257_s26, 0 }
  0x9d   : > { %s1518_s15 = smov (!%p344_p1, %s672_s15), 0  ;;  %s348_s20 = scalar_lea.vmem %s1472_s3, %s1516_s0 }
  0x9e   : > { %335 = vst.msk [vmem:[#allocation4 + $0x2] sm:$0x1] %vm267_vm0, %v334_v33  ;;  %s1520_s15 = smov (!%p673_p5, %s1518_s15), 7  ;;  %v349_v35 = vld [vmem:[%s348_s20] sm:$0x1]  ;;  %p678_p13 = scmp.lt.s32.totalorder %s1257_s26, 7 }
  0x9f   : > { %s352_s13 = scalar_select %p338_p0, 1, 0 }
  0xa0   : > { %s350_s18 = scalar_lea.vmem %s1237_s19, %s1520_s15 [#allocation12]  ;;  %s683_s21 = sadd.s32 4294967288, %s1257_s26 }
  0xa1   : > { %v351_v37 = vld [vmem:[%s350_s18] sm:$0x1]  ;;  %v353_v38 = vstv %s352_s13  ;;  %s369_s16 = scalar_select %p368_p9, %s1257_s26, 0 }
  0xa2   : > { %vm354_vm4 = vcmp.eq.s32.totalorder %v353_v38, 1  ;;  %p373_p3 = scmp.gt.s32.totalorder %s683_s21, 0  ;;  %p684_p4 = scmp.lt.s32.totalorder %s683_s21, 7 }
  0xa3   : > { %v355_v39 = vsel %vm354_vm4, %v349_v35, %v351_v37  ;;  %v362_v40 = vsel %vm354_vm4, %v360_v34, %v361_v36  ;;  %v357_v41 = vsel %vm354_vm4, %v1268_v3, %v1274_v5  ;;  %v359_v42 = vsel %vm354_vm4, %v1272_v4, %v1278_v8  ;;  %s1522_s16 = smov (!%p678_p13, %s369_s16), 7  ;;  %p396_p6 = scmp.lt.s32.totalorder %s1260_s11, 8 }
  0xa4   : > { %356 = vst.msk [vmem:[#allocation2 + $0x3] sm:$0x1] %vm267_vm0, %v355_v39  ;;  %358 = vst.msk [vmem:[#allocation3 + $0x3] sm:$0x1] %vm267_vm0, %v357_v41  ;;  %v363_v43 = vadd.f32 %v362_v40, %v359_v42  ;;  %s1524_s21 = smov (!%p373_p3, %s683_s21), 0  ;;  %s377_s15 = scalar_lea.vmem %s1472_s3, %s1522_s16 }
  0xa5   : > { %s1526_s21 = smov (!%p684_p4, %s1524_s21), 7  ;;  %v378_v45 = vld [vmem:[%s377_s15] sm:$0x1]  ;;  %p397_p7 = scmp.gt.s32.totalorder %s1260_s11, 0 }
  0xa6   : > { %364 = vst.msk [vmem:[#allocation4 + $0x3] sm:$0x1] %vm267_vm0, %v363_v43  ;;  %s381_s0 = scalar_select %p367_p2, 1, 0 }
  0xa7   : > { %s379_s27 = scalar_lea.vmem %s1237_s19, %s1526_s21 [#allocation12]  ;;  %p689_p11 = scmp.lt.s32.totalorder %s1260_s11, 7 }
  0xa8   : > { %v380_v47 = vld [vmem:[%s379_s27] sm:$0x1]  ;;  %v382_v48 = vstv %s381_s0  ;;  %s694_s7 = sadd.s32 4294967288, %s1260_s11  ;;  %s1364_s21 = sld [smem:[#allocation6 + %s423_s14]] }
  0xa9   : > { %vm383_vm5 = vcmp.eq.s32.totalorder %v382_v48, 1  ;;  %s398_s20 = scalar_select %p397_p7, %s1260_s11, 0 }
  0xaa   : > { %v384_v49 = vsel %vm383_vm5, %v378_v45, %v380_v47  ;;  %v391_v50 = vsel %vm383_vm5, %v389_v44, %v390_v46  ;;  %p402_p8 = scmp.gt.s32.totalorder %s694_s7, 0  ;;  %p695_p0 = scmp.lt.s32.totalorder %s694_s7, 7  ;;  %v386_v51 = vsel %vm383_vm5, %v1268_v3, %v1274_v5  ;;  %v388_v52 = vsel %vm383_vm5, %v1272_v4, %v1278_v8 }
  0xab   : > { %385 = vst.msk [vmem:[#allocation2 + $0x4] sm:$0x1] %vm267_vm0, %v384_v49  ;;  %s1528_s20 = smov (!%p689_p11, %s398_s20), 7  ;;  %387 = vst.msk [vmem:[#allocation3 + $0x4] sm:$0x1] %vm267_vm0, %v386_v51  ;;  %v392_v53 = vadd.f32 %v391_v50, %v388_v52  ;;  %s452_s23 = sadd.s32 7, %s1244_s12 }
  0xac   : > { %s1530_s7 = smov (!%p402_p8, %s694_s7), 0  ;;  %s406_s18 = scalar_lea.vmem %s1472_s3, %s1528_s20 }
  0xad   : > { %393 = vst.msk [vmem:[#allocation4 + $0x4] sm:$0x1] %vm267_vm0, %v392_v53  ;;  %s1532_s7 = smov (!%p695_p0, %s1530_s7), 7  ;;  %v407_v55 = vld [vmem:[%s406_s18] sm:$0x1]  ;;  %s1371_s14 = sld [smem:[#allocation6 + %s452_s23]] }
  0xae   : > { %s410_s16 = scalar_select %p396_p6, 1, 0 }
  0xaf   : > { %s408_s8 = scalar_lea.vmem %s1237_s19, %s1532_s7 [#allocation12]  ;;  %p425_p10 = scmp.lt.s32.totalorder %s1364_s21, 8 }
  0xb0   : > { %v409_v57 = vld [vmem:[%s408_s8] sm:$0x1]  ;;  %v411_v58 = vstv %s410_s16  ;;  %p426_p12 = scmp.gt.s32.totalorder %s1364_s21, 0  ;;  %p700_p1 = scmp.lt.s32.totalorder %s1364_s21, 7 }
  0xb1   : > { %vm412_vm6 = vcmp.eq.s32.totalorder %v411_v58, 1  ;;  %s705_s11 = sadd.s32 4294967288, %s1364_s21  ;;  %s1423_s27 = scalar_lea.hbm %s1474_s5, %s1244_s12 }
  0xb2   : > { %v413_v59 = vsel %vm412_vm6, %v407_v55, %v409_v57  ;;  %v420_v60 = vsel %vm412_vm6, %v418_v54, %v419_v56  ;;  %v415_v61 = vsel %vm412_vm6, %v1268_v3, %v1274_v5  ;;  %v417_v62 = vsel %vm412_vm6, %v1272_v4, %v1278_v8  ;;  %s427_s15 = scalar_select %p426_p12, %s1364_s21, 0 }
  0xb3   : > { %414 = vst.msk [vmem:[#allocation2 + $0x5] sm:$0x1] %vm267_vm0, %v413_v59  ;;  %416 = vst.msk [vmem:[#allocation3 + $0x5] sm:$0x1] %vm267_vm0, %v415_v61  ;;  %v421_v63 = vadd.f32 %v420_v60, %v417_v62  ;;  %p431_p5 = scmp.gt.s32.totalorder %s705_s11, 0  ;;  %p706_p2 = scmp.lt.s32.totalorder %s705_s11, 7 }
  0xb4   : > { %s1534_s15 = smov (!%p700_p1, %s427_s15), 7  ;;  %p454_p9 = scmp.lt.s32.totalorder %s1371_s14, 8 }
  0xb5   : > { %422 = vst.msk [vmem:[#allocation4 + $0x5] sm:$0x1] %vm267_vm0, %v421_v63  ;;  %s1536_s11 = smov (!%p431_p5, %s705_s11), 0  ;;  %s435_s7 = scalar_lea.vmem %s1472_s3, %s1534_s15 }
  0xb6   : > { %s1538_s11 = smov (!%p706_p2, %s1536_s11), 7  ;;  %v436_v1 = vld [vmem:[%s435_s7] sm:$0x1]  ;;  %p455_p13 = scmp.gt.s32.totalorder %s1371_s14, 0 }
  0xb7   : > { %s439_s20 = scalar_select %p425_p10, 1, 0 }
  0xb8   : > { %s437_s26 = scalar_lea.vmem %s1237_s19, %s1538_s11 [#allocation12]  ;;  %p711_p3 = scmp.lt.s32.totalorder %s1371_s14, 7 }
  0xb9   : > { %v438_v6 = vld [vmem:[%s437_s26] sm:$0x1]  ;;  %v440_v7 = vstv %s439_s20  ;;  %s716_s13 = sadd.s32 4294967288, %s1371_s14  ;;  %s503_s7 = scalar_lea.sflag [#allocation9], %s216_s17 }
  0xba   : > { %vm441_vm7 = vcmp.eq.s32.totalorder %v440_v7, 1  ;;  %s456_s18 = scalar_select %p455_p13, %s1371_s14, 0 }
  0xbb   : > { %v442_v9 = vsel %vm441_vm7, %v436_v1, %v438_v6  ;;  %v449_v10 = vsel %vm441_vm7, %v447_v0, %v448_v2  ;;  %p460_p4 = scmp.gt.s32.totalorder %s716_s13, 0  ;;  %p717_p6 = scmp.lt.s32.totalorder %s716_s13, 7  ;;  %v444_v11 = vsel %vm441_vm7, %v1268_v3, %v1274_v5  ;;  %v446_v12 = vsel %vm441_vm7, %v1272_v4, %v1278_v8 }
  0xbc   : > { %443 = vst.msk [vmem:[#allocation2 + $0x6] sm:$0x1] %vm267_vm0, %v442_v9  ;;  %s1540_s18 = smov (!%p711_p3, %s456_s18), 7  ;;  %445 = vst.msk [vmem:[#allocation3 + $0x6] sm:$0x1] %vm267_vm0, %v444_v11  ;;  %v450_v13 = vadd.f32 %v449_v10, %v446_v12  ;;  %p1490_p11 = scmp.ne.s32.totalorder %s1483_s24, 0 }
  0xbd   : > { %s1542_s13 = smov (!%p460_p4, %s716_s13), 0  ;;  %s464_s8 = scalar_lea.vmem %s1472_s3, %s1540_s18 }
  0xbe   : > { %451 = vst.msk [vmem:[#allocation4 + $0x6] sm:$0x1] %vm267_vm0, %v450_v13  ;;  %s1544_s13 = smov (!%p717_p6, %s1542_s13), 7  ;;  %v465_v14 = vld [vmem:[%s464_s8] sm:$0x1] }
  0xbf   : > { %s468_s23 = scalar_select %p454_p9, 1, 0 }
  0xc0   : > { %s466_s11 = scalar_lea.vmem %s1237_s19, %s1544_s13 [#allocation12]  ;;  %s242_s19 = scalar_lea.vmem [#allocation13], %s1234_s10 }
  0xc1   : > { %v467_v17 = vld [vmem:[%s466_s11] sm:$0x1]  ;;  %v469_v18 = vstv %s468_s23  ;;  %s516_s14 = sshll.u32 %s242_s19, 4  ;;  %s1010_s10 = smov [#allocation13]   ;;  %s1425_s14 = int_to_ptr.vmem [resolvable:$true] %s516_s14 }
  0xc2   : > { %vm470_vm8 = vcmp.eq.s32.totalorder %v469_v18, 1  ;;  %s926_s20 = scalar_lea.vmem %s1425_s14, 128  ;;  %s930_s26 = sshll.u32 %s1010_s10, 4  ;;  %s931_s26 = int_to_ptr.vmem [resolvable:$false] %s930_s26 }
  0xc3   : > { %v471_v19 = vsel %vm470_vm8, %v465_v14, %v467_v17  ;;  %v478_v20 = vsel %vm470_vm8, %v476_v15, %v477_v16  ;;  %v473_v21 = vsel %vm470_vm8, %v1268_v3, %v1274_v5  ;;  %v475_v22 = vsel %vm470_vm8, %v1272_v4, %v1278_v8  ;;  %p927_p7 = scmp.ne.s32.totalorder %s1425_s14, %s926_s20  ;;  %s932_s13 = scalar_lea.vmem %s931_s26, 256 }
  0xc4   : > { %472 = vst.msk [vmem:[#allocation2 + $0x7] sm:$0x1] %vm267_vm0, %v471_v19  ;;  %474 = vst.msk [vmem:[#allocation3 + $0x7] sm:$0x1] %vm267_vm0, %v473_v21  ;;  %v479_v23 = vadd.f32 %v478_v20, %v475_v22  ;;  %p933_p10 = scmp.lt.s32.totalorder %s1425_s14, %s931_s26  ;;  %p934_p12 = scmp.lt.s32.totalorder %s932_s13, %s926_s20 }
  0xc5   : > { %p928_p8 = pnand %p927_p7, %p1490_p11 }
  0xc6   : > { %480 = vst.msk [vmem:[#allocation4 + $0x7] sm:$0x1] %vm267_vm0, %v479_v23  ;;  %p935_p1 = por %p934_p12, %p933_p10 }
  0xc7   : > { %p929_p0 = pneg %p928_p8 }
  0xc9   : > { %p936_p5 = pnand %p935_p1, %p929_p0 }
  0xcb   : > { %v481_v24 = vld [vmem:[#allocation2] sm:$0xff]  ;;  %v497_v31 = vld [vmem:[#allocation3] sm:$0xff] }
  0xcc   : > { %v483_v25 = vsel %vm482_vm9, %v481_v24, 0.0 }
  0xcd   : > { %484 = vadd.xlane.f32.xlu0 %v483_v25  ;;  %v499_v33 = vld [vmem:[#allocation4] sm:$0xff] }
 0x15a   : > { %v485_v26 = vpop.xlane.xlu0 %484 }
 0x15b   : > { %v487_v27 = vmul.f32 0.03125, %v485_v26 }
 0x15d   : > { %v488_v28 = vsub.f32 %v481_v24, %v487_v27 }
 0x15f   : > { %v489_v3 = vmul.f32 %v488_v28, %v488_v28 }
 0x161   : > { %v490_v4 = vsel %vm482_vm9, %v489_v3, 0.0 }
 0x162   : > { %491 = vadd.xlane.f32.xlu0 %v490_v4 }
 0x1ef   : > { %v492_v5 = vpop.xlane.xlu0 %491 }
 0x1f0   : > { %v493_v8 = vmul.f32 0.03125, %v492_v5 }
 0x1f2   : > { %v494_v29 = vadd.f32 1e-12, %v493_v8 }
 0x1f4   : > { %828 = vrsqrt.f32 %v494_v29 }
 0x1fe   : > { %v829_v30 = vpop.eup %828 }
 0x1ff   : > { %v496_v32 = vmul.f32 %v829_v30, %v488_v28 }
 0x201   : > { %v498_v34 = vmul.f32 %v497_v31, %v496_v32 }
 0x203   : > { %v500_v35 = vadd.f32 %v499_v33, %v498_v34 }
 0x205   : > { %501 = vst.msk [vmem:[%s242_s19] sm:$0xff] %vm482_vm9, %v500_v35 }
 0x206   : > { %939 = shalt.err (!%p936_p5)
}
 0x207   : > { %s940_s17 = scalar_lea.hbm %s1423_s27, 128  ;;  %s944_s21 = scalar_lea.hbm %s1474_s5, 256 }
 0x208   : > { %p941_p2 = scmp.ne.s32.totalorder %s1423_s27, %s940_s17  ;;  %p945_p3 = scmp.lt.u32.totalorder %s1423_s27, %s1474_s5 }
 0x209   : > { %p946_p4 = scmp.lt.u32.totalorder %s944_s21, %s940_s17  ;;  %p948_p7 = scmp.lt.u32.totalorder %s940_s17, %s1423_s27 }
 0x20a   : > { %p942_p9 = pnand %p941_p2, %p1490_p11 }
 0x20b   : > { %p947_p6 = por %p946_p4, %p945_p3 }
 0x20c   : > { %p943_p13 = pneg %p942_p9 }
 0x20d   : > { %p949_p8 = por %p948_p7, %p947_p6 }
 0x20f   : > { %p950_p0 = pnand %p949_p8, %p943_p13 }
 0x211   : > { %953 = shalt.err (!%p950_p0)
}
 0x212   : > { %768 = dma.vmem_to_hbm [thread:$0]  (%p1490_p11), %s1425_s14, 128, %s1423_s27, %s503_s7  }
 0x213 PF: > { %s528_s23 = sand.u32 1, %s990_s28   ;;  %p1491_p10 = scmp.ne.s32.totalorder %s1479_s9, 0 }
 0x214   : > { %p1492_p12 = scmp.ge.s32.totalorder %s1002_s6, 2  ;;  %s529_s11 = scalar_lea.sflag [#allocation9], %s528_s23 }
 0x216   : > { %p782_p1 = pnand %p1492_p12, %p1491_p10 }
 0x218   : > { %985 = dma.done.wait (!%p782_p1), %s529_s11, 128  }
 0x219   : > { %987 = vsyncadd (!%p782_p1), %s529_s11, 4294967168  ;;  %p21_p5 = scmp.ge.s32.totalorder %s1163_s22, 4   ;;  %s1493_s28 = smov %s994_s29 }
 0x21a   : > { %s1494_s29 = smov %s998_s30  ;;  %s1495_s30 = smov %s1179_s25 }
 0x21b   : > { %s1496_s6 = smov %s1163_s22  ;;  %23 = sbr.rel (!%p21_p5) target bundleno = 17 (0x11), region = 105 }
 0x222   :  { %534 = vsyncpa [#allocation8], 1 }
 0x223   :  { %536 = vsyncpa [#allocation8 + $0x1], 1 }
 0x224   :  { %537 = vsyncpa [#allocation11], 1 }
 0x225   :  { %538 = vsyncpa [#allocation9], 1 }
 0x226   :  { %540 = vsyncpa [#allocation9 + $0x1], 1 }

</bundles_post_ra>
